<compile_context>
chip_gen: v5e
topology: v5e:2x2
jax: 0.10.0
libtpu: 0.0.40
codegen_flags: <defaults>
</compile_context>

<pallas_src>
import functools

import numpy as np
import jax
import jax.numpy as jnp
from jax.experimental import pallas as pl
from jax.experimental.pallas import tpu as pltpu


# ------------------------------------------------------------------
# 1x1x1 conv: (Cout, Cin) x (Cin, L) -> (Cout, L), f32 result.
# ------------------------------------------------------------------
def _conv1x1(w_ref, h, mxu_dtype):
    Cout, Cin = w_ref.shape
    L = h.shape[-1]
    if max(Cin, Cout) < 64:
        # Unrolled VPU broadcast-MAC (outer-product accumulation). For tiny channel counts the
        # MXU would be <1% utilized and the VALU has plenty of slack in this memory-bound kernel.
        w = w_ref[...].astype(jnp.float32)
        o = jnp.zeros((Cout, L), jnp.float32)
        for ci in range(Cin):
            o = o + w[:, ci:ci + 1] * h[ci:ci + 1, :].astype(jnp.float32)
        return o
    # Large channel counts: use the MXU.
    return jnp.dot(w_ref[...].astype(mxu_dtype), h.astype(mxu_dtype),
                   preferred_element_type=jnp.float32)


# ------------------------------------------------------------------
# Fused BN(affine) + ReLU + 1x1x1 Conv3d + AvgPool3d(2,2,2) kernel.
# Per grid step (one batch element x one tile of t_do D-pairs):
#   x_ref    : (Cin , Lx)   Lx = t_do*2*H*W   channels on sublanes, flat spatial on lanes
#   bn_ref   : (Cin , 2)    [:,0]=folded BN scale, [:,1]=folded BN shift (f32)
#   w_ref    : (Cout, Cin)  1x1x1 conv weight (f32)
#   pool_ref : (Lx  , Lo)   block-diagonal 2x2x2 avg-pool matrix, Lo = t_do*Ho*Wo
#   o_ref    : (Cout, Lo)
# ------------------------------------------------------------------
def _fused_transition_kernel(x_ref, bn_ref, w_ref, pool_ref, o_ref):
    Cin = x_ref.shape[0]
    Cout = o_ref.shape[0]
    mxu_dt = pool_ref.dtype

    bn = bn_ref[...]                      # (Cin, 2) f32
    scale = bn[:, 0:1]
    shift = bn[:, 1:2]

    # Folded BatchNorm + ReLU on the VPU (always f32).
    h = jnp.maximum(x_ref[...].astype(jnp.float32) * scale + shift, 0.0)      # (Cin, Lx)

    if Cin <= Cout:
        # Pool first: big contraction has Cin rows, intermediate is (Cin, Lo).
        p = jnp.dot(h.astype(mxu_dt), pool_ref[...],
                    preferred_element_type=jnp.float32)                        # (Cin, Lo)
        o = _conv1x1(w_ref, p, mxu_dt)                                         # (Cout, Lo)
    else:
        # Conv first when Cout < Cin (e.g. compression < 1).
        y = _conv1x1(w_ref, h, mxu_dt)                                         # (Cout, Lx)
        o = jnp.dot(y.astype(mxu_dt), pool_ref[...],
                    preferred_element_type=jnp.float32)                        # (Cout, Lo)

    o_ref[...] = o.astype(o_ref.dtype)


# ------------------------------------------------------------------
# Wrapper helpers
# ------------------------------------------------------------------
def _avg2(m):
    """(2m, m) matrix averaging adjacent index pairs (0.5 taps)."""
    return np.repeat(np.eye(m, dtype=np.float32), 2, axis=0) * 0.5


def _choose_d_tile(Do, HoWo):
    """D-pairs per grid step: smallest divisor of Do whose output block is lane-dense
    (multiple of 128 lanes -> unmasked stores, many grid steps) and keeps the pool block small;
    otherwise fall back to the full D extent (block == full array dim, always a legal BlockSpec)."""
    for d in range(1, Do + 1):
        if Do % d == 0 and (d * HoWo) % 128 == 0 and d * HoWo <= 512:
            return d
    # TODO(synk): very large H*W with Ho*Wo not a multiple of 128 falls back to an untiled
    #             (DHW, DHWo) pool block; tile H as well if that ever exceeds VMEM.
    return Do


def transition_forward(x_ncdhw, params, training=False, matmul_dtype=jnp.bfloat16):
    """x_ncdhw: (N, Cin, D, H, W). Returns (N, Cout, D//2, H//2, W//2) in NCDHW, input dtype."""
    gamma, beta, run_mean, run_var, eps, w_oi = params
    N, Cin, D, H, W = x_ncdhw.shape
    Cout = w_oi.shape[0]
    # TODO(synk): odd D/H/W (PyTorch AvgPool3d floors the ragged tail) are not handled.
    assert D % 2 == 0 and H % 2 == 0 and W % 2 == 0

    if training:
        # Train-mode BatchNorm3d: batch statistics (biased variance), computed in one fused pass
        # (sum + sum-of-squares) so x is traversed once instead of three times.
        xf = x_ncdhw.reshape(N, Cin, -1).astype(jnp.float32)
        cnt = N * D * H * W
        s1 = jnp.sum(xf, axis=(0, 2))
        s2 = jnp.sum(xf * xf, axis=(0, 2))
        mean = s1 / cnt
        var = s2 / cnt - mean * mean
    else:
        mean, var = run_mean, run_var
    scale = gamma / jnp.sqrt(var + eps)                               # (Cin,)
    shift = beta - mean * scale                                       # (Cin,)
    bn = jnp.stack([scale, shift], axis=1).astype(jnp.float32)        # (Cin, 2)

    Do, Ho, Wo = D // 2, H // 2, W // 2
    DHW, DHWo, HoWo = D * H * W, Do * Ho * Wo, Ho * Wo

    t_do = _choose_d_tile(Do, HoWo)
    n_tiles = Do // t_do
    Lx = t_do * 2 * H * W           # input lanes per grid step
    Lo = t_do * HoWo                # output lanes per grid step

    # 2x2x2 average pool for one D-pair as a Kronecker product of three tiny 0.5-tap factors,
    # block-diagonal over the t_do D-pairs of a tile. Built once with numpy -> compile-time
    # constant (taps are exactly 0.125, representable in bf16).
    pool_pair = np.kron(_avg2(1), np.kron(_avg2(Ho), _avg2(Wo)))      # (2*H*W, Ho*Wo)
    pool_np = np.kron(np.eye(t_do, dtype=np.float32), pool_pair)      # (Lx, Lo)
    pool = jnp.asarray(pool_np, dtype=matmul_dtype)

    # NCDHW -> (N, Cin, DHW): contiguous reshape, no transpose. Output stays NCDHW too.
    x3 = x_ncdhw.reshape(N, Cin, DHW)

    # Explicit VMEM budget: v5e default scoped limit is 16 MiB, v7x physical VMEM is 64 MiB.
    itemsize = x_ncdhw.dtype.itemsize
    est = (2 * Cin * Lx * itemsize                                    # x block, double-buffered
           + 2 * Cout * Lo * itemsize                                 # out block, double-buffered
           + 2 * pool_np.size * jnp.dtype(matmul_dtype).itemsize      # pool block
           + 2 * (Cin * 2 + Cout * Cin) * 4)                          # bn + weights
    vmem_limit = int(min(max(4 * est, 32 << 20), 64 << 20))

    grid_spec = pltpu.PrefetchScalarGridSpec(
        num_scalar_prefetch=0,
        grid=(N, n_tiles),
        in_specs=[
            pl.BlockSpec((None, Cin, Lx), lambda n, t: (n, 0, t)),
            pl.BlockSpec((Cin, 2), lambda n, t: (0, 0)),
            pl.BlockSpec((Cout, Cin), lambda n, t: (0, 0)),
            pl.BlockSpec((Lx, Lo), lambda n, t: (0, 0)),
        ],
        out_specs=pl.BlockSpec((None, Cout, Lo), lambda n, t: (n, 0, t)),
    )

    out3 = pl.pallas_call(
        _fused_transition_kernel,
        out_shape=jax.ShapeDtypeStruct((N, Cout, DHWo), x_ncdhw.dtype),
        grid_spec=grid_spec,
        compiler_params=pltpu.CompilerParams(
            dimension_semantics=("parallel", "parallel"),
            vmem_limit_bytes=vmem_limit,
        ),
    )(x3, bn, w_oi.astype(jnp.float32), pool)

    return out3.reshape(N, Cout, Do, Ho, Wo)


# ------------------------------------------------------------------
# Pure-JAX reference (same BN semantics) for sanity checks.
# ------------------------------------------------------------------
def transition_reference(x_ncdhw, params, training=False):
    gamma, beta, run_mean, run_var, eps, w_oi = params
    if training:
        mean = jnp.mean(x_ncdhw, axis=(0, 2, 3, 4))
        var = jnp.var(x_ncdhw, axis=(0, 2, 3, 4))
    else:
        mean, var = run_mean, run_var
    scale = gamma / jnp.sqrt(var + eps)
    shift = beta - mean * scale
    h = jnp.maximum(x_ncdhw * scale[None, :, None, None, None]
                    + shift[None, :, None, None, None], 0.0)
    y = jnp.einsum('ncdhw,oc->nodhw', h, w_oi)
    N, Co, D, H, W = y.shape
    y = y.reshape(N, Co, D // 2, 2, H // 2, 2, W // 2, 2).mean(axis=(3, 5, 7))
    return y


if __name__ == "__main__":
    key = jax.random.PRNGKey(0)

    def make_params(k, Cin, Cout, eps=1.1e-05):
        kg, kb, km, kv, kw = jax.random.split(k, 5)
        gamma = 1.0 + 0.1 * jax.random.normal(kg, (Cin,), dtype=jnp.float32)
        beta = 0.1 * jax.random.normal(kb, (Cin,), dtype=jnp.float32)
        run_mean = 0.1 * jax.random.normal(km, (Cin,), dtype=jnp.float32)
        run_var = 1.0 + 0.1 * jax.random.uniform(kv, (Cin,), dtype=jnp.float32)
        # Conv3d weight (Cout, Cin, 1, 1, 1), no bias -> squeezed to (Cout, Cin)
        w_oi = 0.2 * jax.random.normal(kw, (Cout, Cin), dtype=jnp.float32)
        return (gamma, beta, run_mean, run_var, eps, w_oi)

    # ---- Config A: Transition(input_channel=4, num_filters=8, compression=1.0), spatial 16 ----
    # Pool-first branch; t_do=2 -> grid=(2,4), 128-lane output blocks.
    N, Cin, Cout, D, H, W = 2, 4, 8, 16, 16, 16
    k0, k1, key = jax.random.split(key, 3)
    x = jax.random.normal(k0, (N, Cin, D, H, W), dtype=jnp.float32)
    params = make_params(k1, Cin, Cout)

    fwd_bf16 = jax.jit(functools.partial(transition_forward, training=False))
    fwd_f32 = jax.jit(functools.partial(transition_forward, training=False,
                                        matmul_dtype=jnp.float32))
    fwd_train = jax.jit(functools.partial(transition_forward, training=True))

    out = jax.block_until_ready(fwd_bf16(x, params))
    ref = transition_reference(x, params, training=False)
    assert out.shape == (N, Cout, D // 2, H // 2, W // 2), out.shape
    assert jnp.allclose(out, ref, atol=2e-2, rtol=2e-2), float(jnp.max(jnp.abs(out - ref)))

    out32 = jax.block_until_ready(fwd_f32(x, params))
    assert jnp.allclose(out32, ref, atol=1e-4, rtol=1e-4), float(jnp.max(jnp.abs(out32 - ref)))

    out_t = jax.block_until_ready(fwd_train(x, params))
    ref_t = transition_reference(x, params, training=True)
    assert jnp.allclose(out_t, ref_t, atol=2e-2, rtol=2e-2), float(jnp.max(jnp.abs(out_t - ref_t)))

    # ---- Config B: compression=0.5 (Cout < Cin -> conv-first branch), small spatial 8 ----
    N2, Cin2, Cout2, D2 = 2, 8, 4, 8
    k2, k3 = jax.random.split(key, 2)
    x2 = jax.random.normal(k2, (N2, Cin2, D2, D2, D2), dtype=jnp.float32)
    params2 = make_params(k3, Cin2, Cout2)
    fwd_b = jax.jit(functools.partial(transition_forward, training=False,
                                      matmul_dtype=jnp.float32))
    out2 = jax.block_until_ready(fwd_b(x2, params2))
    ref2 = transition_reference(x2, params2, training=False)
    assert out2.shape == (N2, Cout2, D2 // 2, D2 // 2, D2 // 2), out2.shape
    assert jnp.allclose(out2, ref2, atol=1e-4, rtol=1e-4), float(jnp.max(jnp.abs(out2 - ref2)))

    print("KERNEL_OK")
</pallas_src>

<mosaic_0001>
module attributes {stable_mosaic.version = 11 : i64} {
  func.func @_fused_transition_kernel(%arg0: i32, %arg1: i32, %arg2: memref<1x4x1024xf32, #tpu.memory_space<vmem>>, %arg3: memref<4x2xf32, #tpu.memory_space<vmem>>, %arg4: memref<8x4xf32, #tpu.memory_space<vmem>>, %arg5: memref<1024x128xbf16, #tpu.memory_space<vmem>>, %arg6: memref<1x8x128xf32, #tpu.memory_space<vmem>>) attributes {dimension_semantics = [#tpu.dimension_semantics<parallel>, #tpu.dimension_semantics<parallel>], iteration_bounds = array<i64: 2, 4>, scalar_prefetch = 0 : i64, scratch_operands = 0 : i64, tpu.core_type = #tpu.core_type<tc>, window_params = [{transform_indices = @transform_0, window_bounds = array<i64: 1, 4, 1024>}, {pipeline_mode = #tpu.pipeline_mode<synchronous>, transform_indices = @transform_1, window_bounds = array<i64: 4, 2>}, {pipeline_mode = #tpu.pipeline_mode<synchronous>, transform_indices = @transform_2, window_bounds = array<i64: 8, 4>}, {pipeline_mode = #tpu.pipeline_mode<synchronous>, transform_indices = @transform_3, window_bounds = array<i64: 1024, 128>}, {transform_indices = @transform_4, window_bounds = array<i64: 1, 8, 128>}]} {
    %c0 = arith.constant 0 : index
    %c0_0 = arith.constant 0 : index
    %0 = vector.load %arg3[%c0, %c0_0] : memref<4x2xf32, #tpu.memory_space<vmem>>, vector<4x2xf32>
    %1 = vector.extract_strided_slice %0 {offsets = [0, 0], sizes = [4, 1], strides = [1, 1]} : vector<4x2xf32> to vector<4x1xf32>
    %2 = vector.extract_strided_slice %0 {offsets = [0, 1], sizes = [4, 1], strides = [1, 1]} : vector<4x2xf32> to vector<4x1xf32>
    %c0_1 = arith.constant 0 : index
    %c0_2 = arith.constant 0 : index
    %c0_3 = arith.constant 0 : index
    %3 = vector.load %arg2[%c0_1, %c0_2, %c0_3] : memref<1x4x1024xf32, #tpu.memory_space<vmem>>, vector<1x4x1024xf32>
    %4 = vector.shape_cast %3 : vector<1x4x1024xf32> to vector<4x1024xf32>
    %5 = vector.broadcast %1 : vector<4x1xf32> to vector<4x1024xf32>
    %6 = arith.mulf %4, %5 : vector<4x1024xf32>
    %7 = vector.broadcast %2 : vector<4x1xf32> to vector<4x1024xf32>
    %8 = arith.addf %6, %7 : vector<4x1024xf32>
    %cst = arith.constant 0.000000e+00 : f32
    %9 = vector.broadcast %cst : f32 to vector<4x1024xf32>
    %10 = arith.maximumf %8, %9 : vector<4x1024xf32>
    %11 = arith.truncf %10 : vector<4x1024xf32> to vector<4x1024xbf16>
    %c0_4 = arith.constant 0 : index
    %c0_5 = arith.constant 0 : index
    %12 = vector.load %arg5[%c0_4, %c0_5] : memref<1024x128xbf16, #tpu.memory_space<vmem>>, vector<1024x128xbf16>
    %cst_6 = arith.constant dense<0.000000e+00> : vector<4x128xf32>
    %13 = tpu.matmul %11, %12, %cst_6 {dimension_numbers = #tpu.dot_dimension_numbers<[1], [0], [0], [1], [0, 0, 1, 1], [], []>} : vector<4x1024xbf16>, vector<1024x128xbf16>, vector<4x128xf32> -> vector<4x128xf32>
    %c0_7 = arith.constant 0 : index
    %c0_8 = arith.constant 0 : index
    %14 = vector.load %arg4[%c0_7, %c0_8] : memref<8x4xf32, #tpu.memory_space<vmem>>, vector<8x4xf32>
    %cst_9 = arith.constant 0.000000e+00 : f32
    %15 = vector.broadcast %cst_9 : f32 to vector<8x128xf32>
    %16 = vector.extract_strided_slice %14 {offsets = [0, 0], sizes = [8, 1], strides = [1, 1]} : vector<8x4xf32> to vector<8x1xf32>
    %17 = vector.extract_strided_slice %13 {offsets = [0, 0], sizes = [1, 128], strides = [1, 1]} : vector<4x128xf32> to vector<1x128xf32>
    %18 = vector.broadcast %16 : vector<8x1xf32> to vector<8x128xf32>
    %19 = vector.broadcast %17 : vector<1x128xf32> to vector<8x128xf32>
    %20 = arith.mulf %18, %19 : vector<8x128xf32>
    %21 = arith.addf %15, %20 : vector<8x128xf32>
    %22 = vector.extract_strided_slice %14 {offsets = [0, 1], sizes = [8, 1], strides = [1, 1]} : vector<8x4xf32> to vector<8x1xf32>
    %23 = vector.extract_strided_slice %13 {offsets = [1, 0], sizes = [1, 128], strides = [1, 1]} : vector<4x128xf32> to vector<1x128xf32>
    %24 = vector.broadcast %22 : vector<8x1xf32> to vector<8x128xf32>
    %25 = vector.broadcast %23 : vector<1x128xf32> to vector<8x128xf32>
    %26 = arith.mulf %24, %25 : vector<8x128xf32>
    %27 = arith.addf %21, %26 : vector<8x128xf32>
    %28 = vector.extract_strided_slice %14 {offsets = [0, 2], sizes = [8, 1], strides = [1, 1]} : vector<8x4xf32> to vector<8x1xf32>
    %29 = vector.extract_strided_slice %13 {offsets = [2, 0], sizes = [1, 128], strides = [1, 1]} : vector<4x128xf32> to vector<1x128xf32>
    %30 = vector.broadcast %28 : vector<8x1xf32> to vector<8x128xf32>
    %31 = vector.broadcast %29 : vector<1x128xf32> to vector<8x128xf32>
    %32 = arith.mulf %30, %31 : vector<8x128xf32>
    %33 = arith.addf %27, %32 : vector<8x128xf32>
    %34 = vector.extract_strided_slice %14 {offsets = [0, 3], sizes = [8, 1], strides = [1, 1]} : vector<8x4xf32> to vector<8x1xf32>
    %35 = vector.extract_strided_slice %13 {offsets = [3, 0], sizes = [1, 128], strides = [1, 1]} : vector<4x128xf32> to vector<1x128xf32>
    %36 = vector.broadcast %34 : vector<8x1xf32> to vector<8x128xf32>
    %37 = vector.broadcast %35 : vector<1x128xf32> to vector<8x128xf32>
    %38 = arith.mulf %36, %37 : vector<8x128xf32>
    %39 = arith.addf %33, %38 : vector<8x128xf32>
    %c0_10 = arith.constant 0 : index
    %c0_11 = arith.constant 0 : index
    %c0_12 = arith.constant 0 : index
    %40 = vector.load %arg6[%c0_10, %c0_11, %c0_12] : memref<1x8x128xf32, #tpu.memory_space<vmem>>, vector<1x8x128xf32>
    %41 = vector.shape_cast %40 : vector<1x8x128xf32> to vector<8x128xf32>
    %42 = vector.shape_cast %39 : vector<8x128xf32> to vector<1x8x128xf32>
    tpu.vector_store %arg6[%c0_10, %c0_11, %c0_12], %42 {strides = array<i32>} : memref<1x8x128xf32, #tpu.memory_space<vmem>>, vector<1x8x128xf32>,
    return
  }
  func.func @transform_0(%arg0: i32, %arg1: i32) -> (i32, i32, i32) {
    %c0_i32 = arith.constant 0 : i32
    %c0_i32_0 = arith.constant 0 : i32
    return %arg0, %c0_i32, %arg1 : i32, i32, i32
  }
  func.func @transform_1(%arg0: i32, %arg1: i32) -> (i32, i32) {
    %c0_i32 = arith.constant 0 : i32
    %c0_i32_0 = arith.constant 0 : i32
    %c0_i32_1 = arith.constant 0 : i32
    return %c0_i32, %c0_i32_0 : i32, i32
  }
  func.func @transform_2(%arg0: i32, %arg1: i32) -> (i32, i32) {
    %c0_i32 = arith.constant 0 : i32
    %c0_i32_0 = arith.constant 0 : i32
    %c0_i32_1 = arith.constant 0 : i32
    return %c0_i32, %c0_i32_0 : i32, i32
  }
  func.func @transform_3(%arg0: i32, %arg1: i32) -> (i32, i32) {
    %c0_i32 = arith.constant 0 : i32
    %c0_i32_0 = arith.constant 0 : i32
    %c0_i32_1 = arith.constant 0 : i32
    return %c0_i32, %c0_i32_0 : i32, i32
  }
  func.func @transform_4(%arg0: i32, %arg1: i32) -> (i32, i32, i32) {
    %c0_i32 = arith.constant 0 : i32
    %c0_i32_0 = arith.constant 0 : i32
    return %arg0, %c0_i32, %arg1 : i32, i32, i32
  }
}

</mosaic_0001>

<bundles_post_ra>
// kernel: transition_forward.1
= control target key start
LH: loop header
LB: loop body
LE: loop exit
PB: predicated region body
PF: predicated region fallthrough
CT: control target
= control target key end

     0   :  { %s1490_s15 = smov 0   ;;  %s1492_s16 = smov 0   ;;  %s1754_s0 = inlined_call_operand.vmem [shape: f32[2,4,4096], index: 0, kind: input, shape index: {}]   ;;  %s1755_s1 = inlined_call_operand.vmem [shape: f32[4,2], index: 1, kind: input, shape index: {}]   ;;  %s1756_s2 = inlined_call_operand.vmem [shape: f32[8,4], index: 2, kind: input, shape index: {}]   ;;  %s1757_s3 = inlined_call_operand.vmem [shape: bf16[1024,128], index: 3, kind: input, shape index: {}]   ;;  %s1758_s4 = inlined_call_operand.vmem [shape: f32[2,8,512], index: 4, kind: output, shape index: {}]  }
   0x1   :  { %s1494_s17 = smov 0   ;;  %s1496_s18 = smov 0  }
   0x2   :  { %s1498_s19 = smov 0  }
   0x3 LB: > { %s23_s20 = sadd.s32 1, %s1450_s17  ;;  %s26_s21 = sadd.s32 1, %s1454_s18  ;;  %s1458_s19 = sphi %s1498_s19, %s14_s19   ;;  %s1454_s18 = sphi %s1496_s18, %s1762_s18   ;;  %s1450_s17 = sphi %s1494_s17, %s1761_s17   ;;  %s1446_s16 = sphi %s1492_s16, %s1760_s16   ;;  %s1442_s15 = sphi %s1490_s15, %s1759_s15  }
   0x4   : > { %p24_p0 = scmp.ge.s32.totalorder %s23_s20, 4  ;;  %p1040_p1 = scmp.ge.s32.totalorder %s1458_s19, 1 }
   0x5   : > { %p183_p2 = scmp.lt.s32.totalorder %s1458_s19, 9 }
   0x6   : > { %s1764_s20 = smov (%p24_p0, %s23_s20), 0  ;;  %s1766_s21 = smov (!%p24_p0, %s26_s21), %s1454_s18 }
   0x7   : > { %p184_p3 = pnand %p1040_p1, %p183_p2  ;;  %p28_p4 = scmp.ge.s32.totalorder %s1766_s21, 2 }
   0x8   : > { %s1041_s28 = sshll.u32 (!%p184_p3), %s1442_s15, 3  ;;  %p217_p5 = scmp.lt.s32.totalorder (!%p184_p3), %s1446_s16, 1 }
   0x9   : > { %s1768_s21 = smov (%p28_p4, %s1766_s21), 0  ;;  %187 = sbr.rel (%p184_p3) target bundleno = 320 (0x140), region = 36 }
   0xa   : > { %p219_p6 = scmp.lt.s32.totalorder (!%p184_p3), %s1041_s28, 31  ;;  %p228_p7 = scmp.lt.s32.totalorder (!%p184_p3), %s1442_s15, 3 }
   0xe   : > { %v234_v0 = vld [vmem:[%s1755_s1] sm:$0xf]  ;;  %v1311_v1 = vld [vmem:[%s1757_s3 + $0x38] sm:$0xff]  ;;  %v1460_v3 = vmov 0   ;;  %v1310_v6 = vld [vmem:[%s1757_s3 + $0x30] sm:$0xff]  ;;  %v1461_v14 = vmov 1  }
   0xf   : > { %v1319_v2 = vld [vmem:[%s1757_s3 + $0x78] sm:$0xff]  ;;  %1413 = vset.pattern.permute.xlu0 %v1460_v3  ;;  %1415 = vset.pattern.permute.xlu1 %v1460_v3  ;;  %v1318_v7 = vld [vmem:[%s1757_s3 + $0x70] sm:$0xff]  ;;  %v1309_v10 = vld [vmem:[%s1757_s3 + $0x28] sm:$0xff]  ;;  %s1770_s16 = smov (!%p217_p5, %s1446_s16), 1  ;;  %s1772_s28 = smov (!%p219_p6, %s1041_s28), 31 }
  0x10   : > { %v1327_v4 = vld [vmem:[%s1757_s3 + $0xb8] sm:$0xff]  ;;  %241 = vperm.xlu0 %1413, %v234_v0   ;;  %815 = vmatpush.bf16.msra.mxu0 %v1311_v1  ;;  %v1326_v8 = vld [vmem:[%s1757_s3 + $0xb0] sm:$0xff]  ;;  %v1317_v11 = vld [vmem:[%s1757_s3 + $0x68] sm:$0xff]  ;;  %s1042_s26 = sshll.u32 %s1770_s16, 5  ;;  %v1462_v55 = vmov 839922192  }
  0x11   : > { %v1335_v5 = vld [vmem:[%s1757_s3 + $0xf8] sm:$0xff]  ;;  %828 = vmatpush.bf16.msra.mxu1 %v1319_v2  ;;  %841 = vmatpush.bf16.msra.mxu2 %v1327_v4  ;;  %v1334_v9 = vld [vmem:[%s1757_s3 + $0xf0] sm:$0xff]  ;;  %v1325_v12 = vld [vmem:[%s1757_s3 + $0xa8] sm:$0xff]  ;;  %v244_v56 = vunpack.c.l.s4 %v1462_v55  ;;  %s222_s10 = sadd.s32 %s1042_s26, %s1772_s28  ;;  %s1774_s15 = smov (!%p228_p7, %s1442_s15), 3 }
  0x12   : > { %854 = vmatpush.bf16.msra.mxu3 %v1335_v5  ;;  %v1333_v13 = vld [vmem:[%s1757_s3 + $0xe8] sm:$0xff]  ;;  %v1308_v15 = vld [vmem:[%s1757_s3 + $0x20] sm:$0xff]  ;;  %v1307_v19 = vld [vmem:[%s1757_s3 + $0x18] sm:$0xff]  ;;  %s1043_s13 = sshll.u32 %s222_s10, 2 }
  0x13   : > { %v1316_v16 = vld [vmem:[%s1757_s3 + $0x60] sm:$0xff]  ;;  %v1315_v20 = vld [vmem:[%s1757_s3 + $0x58] sm:$0xff]  ;;  %v1306_v23 = vld [vmem:[%s1757_s3 + $0x10] sm:$0xff]  ;;  %v245_v61 = vunpack.c.0.s8 %v244_v56  ;;  %s224_s29 = scalar_lea.vmem %s1754_s0, %s1043_s13 }
  0x14   : > { %816 = vmatpush.bf16.msra.mxu0 %v1310_v6  ;;  %v1324_v17 = vld [vmem:[%s1757_s3 + $0xa0] sm:$0xff]  ;;  %v1323_v21 = vld [vmem:[%s1757_s3 + $0x98] sm:$0xff]  ;;  %v1314_v24 = vld [vmem:[%s1757_s3 + $0x50] sm:$0xff] }
  0x15   : > { %829 = vmatpush.bf16.msra.mxu1 %v1318_v7  ;;  %842 = vmatpush.bf16.msra.mxu2 %v1326_v8  ;;  %v1332_v18 = vld [vmem:[%s1757_s3 + $0xe0] sm:$0xff]  ;;  %v1331_v22 = vld [vmem:[%s1757_s3 + $0xd8] sm:$0xff]  ;;  %v1322_v25 = vld [vmem:[%s1757_s3 + $0x90] sm:$0xff] }
  0x16   : > { %855 = vmatpush.bf16.msra.mxu3 %v1334_v9  ;;  %v1330_v26 = vld [vmem:[%s1757_s3 + $0xd0] sm:$0xff]  ;;  %v1305_v27 = vld [vmem:[%s1757_s3 + $0x8] sm:$0xff]  ;;  %v1304_v31 = vld [vmem:[%s1757_s3] sm:$0xff] }
  0x17   : > { %v1313_v28 = vld [vmem:[%s1757_s3 + $0x48] sm:$0xff]  ;;  %v1312_v32 = vld [vmem:[%s1757_s3 + $0x40] sm:$0xff]  ;;  %v1343_v35 = vld [vmem:[%s1757_s3 + $0x138] sm:$0xff] }
  0x18   : > { %1414 = vset.pattern.permute.xlu0 %v1461_v14  ;;  %817 = vmatpush.bf16.msra.mxu0 %v1309_v10  ;;  %v1321_v29 = vld [vmem:[%s1757_s3 + $0x88] sm:$0xff]  ;;  %v1320_v33 = vld [vmem:[%s1757_s3 + $0x80] sm:$0xff]  ;;  %v1351_v36 = vld [vmem:[%s1757_s3 + $0x178] sm:$0xff] }
  0x19   : > { %253 = vperm.xlu0 %1414, %v234_v0   ;;  %830 = vmatpush.bf16.msra.mxu1 %v1317_v11  ;;  %v1329_v30 = vld [vmem:[%s1757_s3 + $0xc8] sm:$0xff]  ;;  %v1328_v34 = vld [vmem:[%s1757_s3 + $0xc0] sm:$0xff]  ;;  %v1359_v37 = vld [vmem:[%s1757_s3 + $0x1b8] sm:$0xff] }
  0x1a   : > { %843 = vmatpush.bf16.msra.mxu2 %v1325_v12  ;;  %856 = vmatpush.bf16.msra.mxu3 %v1333_v13  ;;  %v1367_v38 = vld [vmem:[%s1757_s3 + $0x1f8] sm:$0xff]  ;;  %v1342_v39 = vld [vmem:[%s1757_s3 + $0x130] sm:$0xff]  ;;  %v1341_v43 = vld [vmem:[%s1757_s3 + $0x128] sm:$0xff] }
  0x1b   : > { %v1350_v40 = vld [vmem:[%s1757_s3 + $0x170] sm:$0xff]  ;;  %v1349_v44 = vld [vmem:[%s1757_s3 + $0x168] sm:$0xff]  ;;  %v1340_v47 = vld [vmem:[%s1757_s3 + $0x120] sm:$0xff] }
  0x1c   : > { %818 = vmatpush.bf16.msra.mxu0 %v1308_v15  ;;  %v1358_v41 = vld [vmem:[%s1757_s3 + $0x1b0] sm:$0xff]  ;;  %v1357_v45 = vld [vmem:[%s1757_s3 + $0x1a8] sm:$0xff]  ;;  %v1348_v48 = vld [vmem:[%s1757_s3 + $0x160] sm:$0xff] }
  0x1d   : > { %831 = vmatpush.bf16.msra.mxu1 %v1316_v16  ;;  %v1366_v42 = vld [vmem:[%s1757_s3 + $0x1f0] sm:$0xff]  ;;  %v1365_v46 = vld [vmem:[%s1757_s3 + $0x1e8] sm:$0xff]  ;;  %v1356_v49 = vld [vmem:[%s1757_s3 + $0x1a0] sm:$0xff] }
  0x1e   : > { %844 = vmatpush.bf16.msra.mxu2 %v1324_v17  ;;  %857 = vmatpush.bf16.msra.mxu3 %v1332_v18  ;;  %v1364_v50 = vld [vmem:[%s1757_s3 + $0x1e0] sm:$0xff]  ;;  %v1339_v51 = vld [vmem:[%s1757_s3 + $0x118] sm:$0xff]  ;;  %v1338_v57 = vld [vmem:[%s1757_s3 + $0x110] sm:$0xff] }
  0x1f   : > { %v1347_v52 = vld [vmem:[%s1757_s3 + $0x158] sm:$0xff]  ;;  %v1346_v59 = vld [vmem:[%s1757_s3 + $0x150] sm:$0xff]  ;;  %v1337_v63 = vld [vmem:[%s1757_s3 + $0x108] sm:$0xff] }
  0x20   : > { %819 = vmatpush.bf16.msra.mxu0 %v1307_v19  ;;  %v1355_v53 = vld [vmem:[%s1757_s3 + $0x198] sm:$0xff]  ;;  %v1354_v60 = vld [vmem:[%s1757_s3 + $0x190] sm:$0xff]  ;;  %v1345_v0 = vld [vmem:[%s1757_s3 + $0x148] sm:$0xff] }
  0x21   : > { %832 = vmatpush.bf16.msra.mxu1 %v1315_v20  ;;  %v1363_v54 = vld [vmem:[%s1757_s3 + $0x1d8] sm:$0xff]  ;;  %v1362_v62 = vld [vmem:[%s1757_s3 + $0x1d0] sm:$0xff]  ;;  %v1353_v1 = vld [vmem:[%s1757_s3 + $0x188] sm:$0xff] }
  0x22   : > { %845 = vmatpush.bf16.msra.mxu2 %v1323_v21  ;;  %858 = vmatpush.bf16.msra.mxu3 %v1331_v22  ;;  %v1361_v3 = vld [vmem:[%s1757_s3 + $0x1c8] sm:$0xff]  ;;  %v235_v4 = vld [vmem:[%s224_s29] sm:$0xff]  ;;  %v237_v6 = vld [vmem:[%s224_s29 + $0x10] sm:$0xff] }
  0x23   : > { %v236_v5 = vld [vmem:[%s224_s29 + $0x8] sm:$0xff]  ;;  %v238_v7 = vld [vmem:[%s224_s29 + $0x18] sm:$0xff]  ;;  %v1336_v8 = vld [vmem:[%s1757_s3 + $0x100] sm:$0xff]  ;;  %s1044_s29 = sshll.u32 %s1770_s16, 2 }
  0x24   : > { %820 = vmatpush.bf16.msra.mxu0 %v1306_v23  ;;  %v1344_v9 = vld [vmem:[%s1757_s3 + $0x140] sm:$0xff]  ;;  %s231_s30 = sadd.s32 %s1044_s29, %s1774_s15 }
  0x25   : > { %833 = vmatpush.bf16.msra.mxu1 %v1314_v24  ;;  %v1352_v12 = vld [vmem:[%s1757_s3 + $0x180] sm:$0xff]  ;;  %s1045_s5 = sshll.u32 %s231_s30, 3 }
  0x26   : > { %846 = vmatpush.bf16.msra.mxu2 %v1322_v25  ;;  %859 = vmatpush.bf16.msra.mxu3 %v1330_v26  ;;  %v1360_v13 = vld [vmem:[%s1757_s3 + $0x1c0] sm:$0xff]  ;;  %s233_s16 = scalar_lea.vmem %s1758_s4, %s1045_s5 }
  0x27   : > { %v919_v19 = vld [vmem:[%s1756_s2] sm:$0xff] }
  0x28   : > { %821 = vmatpush.bf16.msra.mxu0 %v1305_v27  ;;  %922 = vperm.xlu1 %1415, %v919_v19   ;;  %v1463_v27 = vmov 2  }
  0x29   : > { %834 = vmatpush.bf16.msra.mxu1 %v1313_v28  ;;  %1417 = vset.pattern.permute.xlu2 %v1463_v27 }
  0x2a   : > { %847 = vmatpush.bf16.msra.mxu2 %v1321_v29  ;;  %860 = vmatpush.bf16.msra.mxu3 %v1329_v30  ;;  %v1464_v29 = vmov 3  }
  0x2b   : > { %936 = vperm.xlu2 %1417, %v919_v19   ;;  %1419 = vset.pattern.permute.xlu0 %v1464_v29 }
  0x2c   : > { %822 = vmatpush.bf16.msra.mxu0 %v1304_v31 }
  0x2d   : > { %835 = vmatpush.bf16.msra.mxu1 %v1312_v32 }
  0x2e   : > { %848 = vmatpush.bf16.msra.mxu2 %v1320_v33  ;;  %861 = vmatpush.bf16.msra.mxu3 %v1328_v34 }
  0x30   : > { %867 = vmatpush.bf16.msrb.mxu0 %v1343_v35  ;;  %1416 = vset.pattern.permute.xlu1 %v1461_v14 }
  0x31   : > { %880 = vmatpush.bf16.msrb.mxu1 %v1351_v36  ;;  %929 = vperm.xlu1 %1416, %v919_v19  }
  0x32   : > { %893 = vmatpush.bf16.msrb.mxu2 %v1359_v37  ;;  %906 = vmatpush.bf16.msrb.mxu3 %v1367_v38 }
  0x33   : > { %1418 = vset.pattern.permute.xlu2 %v1464_v29 }
  0x34   : > { %868 = vmatpush.bf16.msrb.mxu0 %v1342_v39  ;;  %943 = vperm.xlu2 %1418, %v919_v19  }
  0x35   : > { %881 = vmatpush.bf16.msrb.mxu1 %v1350_v40 }
  0x36   : > { %894 = vmatpush.bf16.msrb.mxu2 %v1358_v41  ;;  %907 = vmatpush.bf16.msrb.mxu3 %v1366_v42 }
  0x38   : > { %869 = vmatpush.bf16.msrb.mxu0 %v1341_v43 }
  0x39   : > { %882 = vmatpush.bf16.msrb.mxu1 %v1349_v44 }
  0x3a   : > { %895 = vmatpush.bf16.msrb.mxu2 %v1357_v45  ;;  %908 = vmatpush.bf16.msrb.mxu3 %v1365_v46 }
  0x3c   : > { %870 = vmatpush.bf16.msrb.mxu0 %v1340_v47 }
  0x3d   : > { %883 = vmatpush.bf16.msrb.mxu1 %v1348_v48 }
  0x3e   : > { %896 = vmatpush.bf16.msrb.mxu2 %v1356_v49  ;;  %909 = vmatpush.bf16.msrb.mxu3 %v1364_v50 }
  0x40   : > { %871 = vmatpush.bf16.msrb.mxu0 %v1339_v51 }
  0x41   : > { %884 = vmatpush.bf16.msrb.mxu1 %v1347_v52 }
  0x42   : > { %897 = vmatpush.bf16.msrb.mxu2 %v1355_v53  ;;  %910 = vmatpush.bf16.msrb.mxu3 %v1363_v54 }
  0x44   : > { %872 = vmatpush.bf16.msrb.mxu0 %v1338_v57 }
  0x45   : > { %885 = vmatpush.bf16.msrb.mxu1 %v1346_v59 }
  0x46   : > { %898 = vmatpush.bf16.msrb.mxu2 %v1354_v60  ;;  %911 = vmatpush.bf16.msrb.mxu3 %v1362_v62 }
  0x48   : > { %873 = vmatpush.bf16.msrb.mxu0 %v1337_v63 }
  0x49   : > { %886 = vmatpush.bf16.msrb.mxu1 %v1345_v0 }
  0x4a   : > { %899 = vmatpush.bf16.msrb.mxu2 %v1353_v1  ;;  %912 = vmatpush.bf16.msrb.mxu3 %v1361_v3 }
  0x4c   : > { %874 = vmatpush.bf16.msrb.mxu0 %v1336_v8 }
  0x4d   : > { %887 = vmatpush.bf16.msrb.mxu1 %v1344_v9 }
  0x4e   : > { %900 = vmatpush.bf16.msrb.mxu2 %v1352_v12  ;;  %913 = vmatpush.bf16.msrb.mxu3 %v1360_v13 }
  0x82   : > { %v242_v58 = vpop.permute.xlu0 %241 }
  0x83   : > { %v246_v2 = vperm.slane %v242_v58, %v245_v61 }
  0x85   : > { %v248_v10 = vmul.f32 %v246_v2, %v235_v4  ;;  %v249_v15 = vmul.f32 %v246_v2, %v236_v5  ;;  %v250_v16 = vmul.f32 %v246_v2, %v237_v6  ;;  %v251_v17 = vmul.f32 %v246_v2, %v238_v7  ;;  %v937_v60 = vpop.permute.xlu2 %936 }
  0x8b   : > { %v254_v11 = vpop.permute.xlu0 %253 }
  0x8c   : > { %v258_v18 = vperm.slane %v254_v11, %v245_v61 }
  0x8e   : > { %v260_v20 = vadd.f32 %v258_v18, %v248_v10  ;;  %v261_v21 = vadd.f32 %v258_v18, %v249_v15  ;;  %v262_v22 = vadd.f32 %v258_v18, %v250_v16  ;;  %v263_v23 = vadd.f32 %v258_v18, %v251_v17  ;;  %v944_v8 = vpop.permute.xlu2 %943 }
  0x90   : > { %v264_v24 = vmax.f32 %v260_v20, 0.0  ;;  %v265_v25 = vmax.f32 %v261_v21, 0.0  ;;  %v266_v26 = vmax.f32 %v262_v22, 0.0  ;;  %v267_v28 = vmax.f32 %v263_v23, 0.0 }
  0x92   : > { %272 = vst [vmem:[#allocation1] ss:$2 sm:$0xff] %v264_v24 }
  0x93   : > { %274 = vst [vmem:[#allocation1 + $0x10] ss:$2 sm:$0xff] %v265_v25 }
  0x94   : > { %276 = vst [vmem:[#allocation1 + $0x20] ss:$2 sm:$0xff] %v266_v26 }
  0x95   : > { %278 = vst [vmem:[#allocation1 + $0x30] ss:$2 sm:$0xff] %v267_v28 }
  0x99   : > { %v279_v30 = vld.sshfl [vmem:[#allocation1] sm:$0xff pattern:$0x75316420]  ;;  %v280_v31 = vld.sshfl [vmem:[#allocation1 + $0x8] sm:$0xff pattern:$0x75316420] }
  0x9a   : > { %v295_v32 = vpack.c.bf16 %v279_v30, %v279_v30  ;;  %v296_v33 = vpack.c.bf16 %v280_v31, %v280_v31  ;;  %v281_v34 = vld.sshfl [vmem:[#allocation1 + $0x10] sm:$0xff pattern:$0x75316420]  ;;  %v282_v35 = vld.sshfl [vmem:[#allocation1 + $0x18] sm:$0xff pattern:$0x75316420]  ;;  %v923_v58 = vpop.permute.xlu1 %922 }
  0x9b   : > { %v297_v36 = vpack.c.bf16 %v281_v34, %v281_v34  ;;  %v298_v37 = vpack.c.bf16 %v282_v35, %v282_v35  ;;  %v283_v38 = vld.sshfl [vmem:[#allocation1 + $0x20] sm:$0xff pattern:$0x75316420]  ;;  %v284_v39 = vld.sshfl [vmem:[#allocation1 + $0x28] sm:$0xff pattern:$0x75316420] }
  0x9c   : > { %823 = vmatmul.bf16.vlgmr.msra.gmra.mxu0 %v295_v32  ;;  %836 = vmatmul.bf16.vlgmr.msra.gmra.mxu1 %v296_v33  ;;  %v285_v40 = vld.sshfl [vmem:[#allocation1 + $0x30] sm:$0xff pattern:$0x75316420]  ;;  %v286_v41 = vld.sshfl [vmem:[#allocation1 + $0x38] sm:$0xff pattern:$0x75316420]  ;;  %v299_v14 = vpack.c.bf16 %v283_v38, %v283_v38  ;;  %v300_v42 = vpack.c.bf16 %v284_v39, %v284_v39 }
  0x9d   : > { %849 = vmatmul.bf16.vlgmr.msra.gmra.mxu2 %v297_v36  ;;  %862 = vmatmul.bf16.vlgmr.msra.gmra.mxu3 %v298_v37  ;;  %v301_v43 = vpack.c.bf16 %v285_v40, %v285_v40  ;;  %v302_v44 = vpack.c.bf16 %v286_v41, %v286_v41 }
  0xa3   : > { %v930_v4 = vpop.permute.xlu1 %929 }
  0xac   : > { %875 = vmatmul.bf16.vlgmr.msrb.gmra.mxu0 %v299_v14  ;;  %888 = vmatmul.bf16.vlgmr.msrb.gmra.mxu1 %v300_v42 }
  0xad   : > { %901 = vmatmul.bf16.vlgmr.msrb.gmra.mxu2 %v301_v43  ;;  %914 = vmatmul.bf16.vlgmr.msrb.gmra.mxu3 %v302_v44 }
 0x119   : > { %v824_v45 = vpop.f32.mrf.mxu0  ;;  %v837_v46 = vpop.f32.mrf.mxu1 }
 0x11a   : > { %v838_v51 = vadd.f32 %v837_v46, %v824_v45 }
 0x120   : > { %v850_v47 = vpop.f32.mrf.mxu2  ;;  %v863_v48 = vpop.f32.mrf.mxu3 }
 0x121   : > { %v826_v49 = vpop.f32.mrf.mxu0  ;;  %v839_v50 = vpop.f32.mrf.mxu1  ;;  %v851_v52 = vadd.f32 %v850_v47, %v838_v51 }
 0x123   : > { %v864_v55 = vadd.f32 %v863_v48, %v851_v52 }
 0x128   : > { %v852_v53 = vpop.f32.mrf.mxu2  ;;  %v865_v54 = vpop.f32.mrf.mxu3 }
 0x129   : > { %v876_v56 = vpop.f32.mrf.mxu0  ;;  %v889_v57 = vpop.f32.mrf.mxu1 }
 0x12a   : > { %v877_v59 = vadd.f32 %v876_v56, %v864_v55 }
 0x12c   : > { %v890_v61 = vadd.f32 %v889_v57, %v877_v59 }
 0x130   : > { %v902_v62 = vpop.f32.mrf.mxu2  ;;  %v915_v63 = vpop.f32.mrf.mxu3 }
 0x131   : > { %v903_v0 = vadd.f32 %v902_v62, %v890_v61  ;;  %v878_v1 = vpop.f32.mrf.mxu0  ;;  %v891_v2 = vpop.f32.mrf.mxu1 }
 0x133   : > { %v916_v3 = vadd.f32 %v915_v63, %v903_v0 }
 0x135   : > { %v925_v5 = vperm.slane %v916_v3, 0  ;;  %v932_v6 = vperm.slane %v916_v3, 1  ;;  %v939_v7 = vperm.slane %v916_v3, 2  ;;  %v946_v9 = vperm.slane %v916_v3, 3 }
 0x137   : > { %v926_v10 = vmul.f32 %v925_v5, %v923_v58  ;;  %v933_v11 = vmul.f32 %v932_v6, %v930_v4  ;;  %v940_v16 = vmul.f32 %v939_v7, %v937_v60  ;;  %v947_v17 = vmul.f32 %v946_v9, %v944_v8 }
 0x138   : > { %v904_v12 = vpop.f32.mrf.mxu2  ;;  %v917_v13 = vpop.f32.mrf.mxu3 }
 0x139   : > { %v934_v15 = vadd.f32 %v933_v11, %v926_v10 }
 0x13b   : > { %v941_v18 = vadd.f32 %v940_v16, %v934_v15 }
 0x13d   : > { %v948_v19 = vadd.f32 %v947_v17, %v941_v18 }
 0x13f   : > { %949 = vst [vmem:[%s233_s16] sm:$0xff] %v948_v19 }
 0x140 PF: > { %s14_s19 = sadd.s32 1, %s1458_s19   ;;  %s1759_s15 = smov %s1450_s17 }
 0x141   : > { %p11_p8 = scmp.ge.s32.totalorder %s14_s19, 10   ;;  %s1760_s16 = smov %s1454_s18 }
 0x142   : > { %s1761_s17 = smov %s1764_s20  ;;  %s1762_s18 = smov %s1768_s21 }
 0x143   :  { %13 = sbr.rel (!%p11_p8) target bundleno = 3 (0x3), region = 69 }

</bundles_post_ra>
